<compile_context>
chip_gen: v7x
topology: tpu7x:2x2x1
jax: 0.10.0
libtpu: 0.0.40
codegen_flags: <defaults>
</compile_context>

<pallas_src>
import functools

import numpy as np
import jax
import jax.numpy as jnp
from jax import lax
from jax.experimental import pallas as pl
from jax.experimental.pallas import tpu as pltpu

_LANES = 128
_SUBLANES = 8


def _binary_focal_kernel(x_ref, t_ref, pos_ref, neg_ref, npos_ref, nneg_ref,
                         *, alpha0, alpha1, gamma, smooth):
    """Processes one (tile_rows, 128) tile of logits/targets.

    Outputs are four (1, 8, 128) partial-sum accumulators (one set per core)
    that stay resident in VMEM across the inner ("arbitrary") grid axis.
    """
    i = pl.program_id(1)  # inner reduction step for this core

    @pl.when(i == 0)
    def _():
        pos_ref[...] = jnp.zeros_like(pos_ref)
        neg_ref[...] = jnp.zeros_like(neg_ref)
        npos_ref[...] = jnp.zeros_like(npos_ref)
        nneg_ref[...] = jnp.zeros_like(nneg_ref)

    x = x_ref[...].astype(jnp.float32)   # (tr, 128) logits
    t = t_ref[...]                       # (tr, 128) int32 labels (0/1, -1 = pad)

    prob = 1.0 / (1.0 + jnp.exp(-x))               # sigmoid
    prob = jnp.clip(prob, smooth, 1.0 - smooth)    # torch.clamp(prob, smooth, 1-smooth)
    one_m_p = 1.0 - prob

    is_pos = t == 1
    is_neg = t == 0
    pos_mask = is_pos.astype(jnp.float32)
    neg_mask = is_neg.astype(jnp.float32)

    # Select operands *before* the transcendentals so only one log and one pow
    # run per element (the EUP is the limiting unit for this kernel).  For
    # padded elements (t == -1) the operands are still valid probabilities, so
    # no NaN/Inf is ever produced; the masks zero them out.
    log_arg = jnp.where(is_pos, prob, one_m_p)
    pow_arg = jnp.where(is_pos, one_m_p, prob)
    alpha_sel = jnp.where(is_pos, alpha0, alpha1)

    if float(gamma) == int(gamma):
        powed = lax.integer_pow(pow_arg, int(gamma))      # gamma=2 -> x*x (VPU)
    else:
        powed = jnp.power(pow_arg, jnp.float32(gamma))    # non-integer gamma only

    loss_sel = -alpha_sel * powed * jnp.log(log_arg)
    pos_loss = loss_sel * pos_mask   # == -a0*(1-p)^g*log(p)   where t==1, else 0
    neg_loss = loss_sel * neg_mask   # == -a1*p^g*log(1-p)     where t==0, else 0

    tr, lanes = pos_loss.shape

    def fold(v):
        # (tr, 128) -> (1, 8, 128) using only full-vreg VPU adds; the expensive
        # cross-lane/sublane reduction happens once, outside the kernel.
        return jnp.sum(v.reshape(tr // _SUBLANES, _SUBLANES, lanes),
                       axis=0, keepdims=True)

    pos_ref[...] += fold(pos_loss)
    neg_ref[...] += fold(neg_loss)
    npos_ref[...] += fold(pos_mask)
    nneg_ref[...] += fold(neg_mask)


def binary_focal_loss(output, target, *, alpha=(1.0, 1.0), gamma=2,
                      smooth=1e-6, tile_rows=1024, num_cores=2):
    """JAX/Pallas equivalent of BinaryFocalLoss.forward.

    output: logits, any shape.
    target: same shape, values in {0, 1}.
    """
    # --- alpha handling mirrors the module __init__ -------------------------
    if isinstance(alpha, (float, int)) and not isinstance(alpha, bool):
        a0, a1 = float(alpha), 1.0 - float(alpha)
    else:
        a = np.asarray(alpha, dtype=np.float64).reshape(2)
        a0, a1 = float(a[0]), float(a[1])

    # --- flatten to a lane-dense (rows, 128) slab (no transpose, free reshape)
    x_flat = jnp.reshape(output, (-1,))
    t_flat = jnp.reshape(target, (-1,)).astype(jnp.int32)
    m = x_flat.shape[0]

    rows = pl.cdiv(m, _LANES)
    rows = ((rows + _SUBLANES - 1) // _SUBLANES) * _SUBLANES        # sublane align
    tr = max(_SUBLANES, (min(int(tile_rows), rows) // _SUBLANES) * _SUBLANES)
    chunk = num_cores * tr
    rows_pad = ((rows + chunk - 1) // chunk) * chunk
    bpc = rows_pad // chunk                                          # blocks/core

    m_pad = rows_pad * _LANES
    if m_pad != m:
        x_flat = jnp.pad(x_flat, (0, m_pad - m))                     # sigmoid(0) is fine
        t_flat = jnp.pad(t_flat, (0, m_pad - m), constant_values=-1)  # pad -> no mask
    x2d = x_flat.reshape(rows_pad, _LANES)
    t2d = t_flat.reshape(rows_pad, _LANES)

    kernel = functools.partial(
        _binary_focal_kernel,
        alpha0=a0, alpha1=a1, gamma=gamma, smooth=float(smooth))

    acc_shape = jax.ShapeDtypeStruct((num_cores, _SUBLANES, _LANES), jnp.float32)
    acc_spec = pl.BlockSpec((1, _SUBLANES, _LANES), lambda c, i: (c, 0, 0))
    data_spec = pl.BlockSpec((tr, _LANES), lambda c, i: (c * bpc + i, 0))

    pos_p, neg_p, npos_p, nneg_p = pl.pallas_call(
        kernel,
        out_shape=(acc_shape, acc_shape, acc_shape, acc_shape),
        grid_spec=pltpu.PrefetchScalarGridSpec(
            num_scalar_prefetch=0,
            grid=(num_cores, bpc),
            in_specs=[data_spec, data_spec],
            out_specs=(acc_spec, acc_spec, acc_spec, acc_spec),
        ),
        compiler_params=pltpu.CompilerParams(
            dimension_semantics=("parallel", "arbitrary")),
    )(x2d, t2d)

    # Final tiny reductions + the `if num_pos == 0` combine (done on scalars).
    pos_sum = jnp.sum(pos_p)
    neg_sum = jnp.sum(neg_p)
    num_pos = jnp.sum(npos_p)
    num_neg = jnp.sum(nneg_p)
    loss_with_pos = pos_sum / num_pos + neg_sum / num_neg
    return jnp.where(num_pos == 0.0, neg_sum, loss_with_pos)


def _binary_focal_loss_ref(output, target, *, alpha=(1.0, 1.0), gamma=2,
                           smooth=1e-6):
    """Pure-JAX reference mirroring the PyTorch forward exactly."""
    prob = jax.nn.sigmoid(output.astype(jnp.float32))
    prob = jnp.clip(prob, smooth, 1.0 - smooth)
    pos_mask = (target == 1).astype(jnp.float32)
    neg_mask = (target == 0).astype(jnp.float32)
    pos_loss = -alpha[0] * jnp.power(1.0 - prob, gamma) * jnp.log(prob) * pos_mask
    neg_loss = -alpha[1] * jnp.power(prob, gamma) * jnp.log(1.0 - prob) * neg_mask
    pos_sum = pos_loss.sum()
    neg_sum = neg_loss.sum()
    num_pos = pos_mask.sum()
    num_neg = neg_mask.sum()
    return jnp.where(num_pos == 0.0, neg_sum,
                     pos_sum / num_pos + neg_sum / num_neg)


if __name__ == "__main__":
    key = jax.random.PRNGKey(0)
    k1, k2, k3, k4 = jax.random.split(key, 4)

    alpha = [0.25, 0.75]
    gamma = 2

    # Binary segmentation style inputs: NCHW logits + {0,1} targets of same shape.
    logits = jax.random.normal(k1, (2, 1, 16, 16), jnp.float32)
    target = jax.random.bernoulli(k2, 0.3, (2, 1, 16, 16)).astype(jnp.int32)

    loss = binary_focal_loss(logits, target, alpha=alpha, gamma=gamma)
    loss = jax.block_until_ready(loss)
    ref = _binary_focal_loss_ref(logits, target, alpha=tuple(alpha), gamma=gamma)
    assert jnp.allclose(loss, ref, rtol=1e-4, atol=1e-6), (loss, ref)

    # Awkward, non-aligned size with a tiny tile so the inner reduction axis
    # actually iterates and the padding path is exercised.
    logits2 = jax.random.normal(k3, (3, 1, 33, 47), jnp.float32)
    target2 = jax.random.bernoulli(k4, 0.5, (3, 1, 33, 47)).astype(jnp.int32)
    loss2 = binary_focal_loss(logits2, target2, alpha=alpha, gamma=gamma,
                              tile_rows=8)
    loss2 = jax.block_until_ready(loss2)
    ref2 = _binary_focal_loss_ref(logits2, target2, alpha=tuple(alpha), gamma=gamma)
    assert jnp.allclose(loss2, ref2, rtol=1e-4, atol=1e-6), (loss2, ref2)

    print("KERNEL_OK")
</pallas_src>

<mosaic_0001>
module attributes {stable_mosaic.version = 11 : i64} {
  func.func @_binary_focal_kernel(%arg0: i32, %arg1: i32, %arg2: memref<8x128xf32, #tpu.memory_space<vmem>>, %arg3: memref<8x128xi32, #tpu.memory_space<vmem>>, %arg4: memref<1x8x128xf32, #tpu.memory_space<vmem>>, %arg5: memref<1x8x128xf32, #tpu.memory_space<vmem>>, %arg6: memref<1x8x128xf32, #tpu.memory_space<vmem>>, %arg7: memref<1x8x128xf32, #tpu.memory_space<vmem>>) attributes {dimension_semantics = [#tpu.dimension_semantics<parallel>, #tpu.dimension_semantics<arbitrary>], iteration_bounds = array<i64: 2, 1>, scalar_prefetch = 0 : i64, scratch_operands = 0 : i64, tpu.core_type = #tpu.core_type<tc>, window_params = [{transform_indices = @transform_0, window_bounds = array<i64: 8, 128>}, {transform_indices = @transform_1, window_bounds = array<i64: 8, 128>}, {transform_indices = @transform_2, window_bounds = array<i64: 1, 8, 128>}, {transform_indices = @transform_3, window_bounds = array<i64: 1, 8, 128>}, {transform_indices = @transform_4, window_bounds = array<i64: 1, 8, 128>}, {transform_indices = @transform_5, window_bounds = array<i64: 1, 8, 128>}]} {
    %c0_i32 = arith.constant 0 : i32
    %0 = arith.cmpi eq, %arg1, %c0_i32 : i32
    %1 = arith.extui %0 : i1 to i32
    %c0_i32_0 = arith.constant 0 : i32
    %2 = arith.cmpi ne, %1, %c0_i32_0 : i32
    scf.if %2 {
      %cst_41 = arith.constant 0.000000e+00 : f32
      %63 = vector.broadcast %cst_41 : f32 to vector<1x8x128xf32>
      %c0_42 = arith.constant 0 : index
      %c0_43 = arith.constant 0 : index
      %c0_44 = arith.constant 0 : index
      %64 = vector.load %arg4[%c0_42, %c0_43, %c0_44] : memref<1x8x128xf32, #tpu.memory_space<vmem>>, vector<1x8x128xf32>
      tpu.vector_store %arg4[%c0_42, %c0_43, %c0_44], %63 {strides = array<i32>} : memref<1x8x128xf32, #tpu.memory_space<vmem>>, vector<1x8x128xf32>,
      %cst_45 = arith.constant 0.000000e+00 : f32
      %65 = vector.broadcast %cst_45 : f32 to vector<1x8x128xf32>
      %c0_46 = arith.constant 0 : index
      %c0_47 = arith.constant 0 : index
      %c0_48 = arith.constant 0 : index
      %66 = vector.load %arg5[%c0_46, %c0_47, %c0_48] : memref<1x8x128xf32, #tpu.memory_space<vmem>>, vector<1x8x128xf32>
      tpu.vector_store %arg5[%c0_46, %c0_47, %c0_48], %65 {strides = array<i32>} : memref<1x8x128xf32, #tpu.memory_space<vmem>>, vector<1x8x128xf32>,
      %cst_49 = arith.constant 0.000000e+00 : f32
      %67 = vector.broadcast %cst_49 : f32 to vector<1x8x128xf32>
      %c0_50 = arith.constant 0 : index
      %c0_51 = arith.constant 0 : index
      %c0_52 = arith.constant 0 : index
      %68 = vector.load %arg6[%c0_50, %c0_51, %c0_52] : memref<1x8x128xf32, #tpu.memory_space<vmem>>, vector<1x8x128xf32>
      tpu.vector_store %arg6[%c0_50, %c0_51, %c0_52], %67 {strides = array<i32>} : memref<1x8x128xf32, #tpu.memory_space<vmem>>, vector<1x8x128xf32>,
      %cst_53 = arith.constant 0.000000e+00 : f32
      %69 = vector.broadcast %cst_53 : f32 to vector<1x8x128xf32>
      %c0_54 = arith.constant 0 : index
      %c0_55 = arith.constant 0 : index
      %c0_56 = arith.constant 0 : index
      %70 = vector.load %arg7[%c0_54, %c0_55, %c0_56] : memref<1x8x128xf32, #tpu.memory_space<vmem>>, vector<1x8x128xf32>
      tpu.vector_store %arg7[%c0_54, %c0_55, %c0_56], %69 {strides = array<i32>} : memref<1x8x128xf32, #tpu.memory_space<vmem>>, vector<1x8x128xf32>,
    } else {
    }
    %c0 = arith.constant 0 : index
    %c0_1 = arith.constant 0 : index
    %3 = vector.load %arg2[%c0, %c0_1] : memref<8x128xf32, #tpu.memory_space<vmem>>, vector<8x128xf32>
    %c0_2 = arith.constant 0 : index
    %c0_3 = arith.constant 0 : index
    %4 = vector.load %arg3[%c0_2, %c0_3] : memref<8x128xi32, #tpu.memory_space<vmem>>, vector<8x128xi32>
    %cst = arith.constant 0.000000e+00 : f32
    %5 = vector.broadcast %cst : f32 to vector<8x128xf32>
    %6 = arith.subf %5, %3 : vector<8x128xf32>
    %7 = math.exp %6 : vector<8x128xf32>
    %cst_4 = arith.constant 1.000000e+00 : f32
    %8 = vector.broadcast %cst_4 : f32 to vector<8x128xf32>
    %9 = arith.addf %8, %7 : vector<8x128xf32>
    %cst_5 = arith.constant 1.000000e+00 : f32
    %10 = vector.broadcast %cst_5 : f32 to vector<8x128xf32>
    %11 = arith.divf %10, %9 : vector<8x128xf32>
    %cst_6 = arith.constant 9.99999997E-7 : f32
    %cst_7 = arith.constant 0.999998986 : f32
    %12 = vector.broadcast %cst_6 : f32 to vector<8x128xf32>
    %13 = arith.maximumf %12, %11 : vector<8x128xf32>
    %14 = vector.broadcast %cst_7 : f32 to vector<8x128xf32>
    %15 = arith.minimumf %14, %13 : vector<8x128xf32>
    %cst_8 = arith.constant 1.000000e+00 : f32
    %16 = vector.broadcast %cst_8 : f32 to vector<8x128xf32>
    %17 = arith.subf %16, %15 : vector<8x128xf32>
    %c1_i32 = arith.constant 1 : i32
    %18 = vector.broadcast %c1_i32 : i32 to vector<8x128xi32>
    %19 = arith.cmpi eq, %4, %18 : vector<8x128xi32>
    %c0_i32_9 = arith.constant 0 : i32
    %20 = vector.broadcast %c0_i32_9 : i32 to vector<8x128xi32>
    %21 = arith.cmpi eq, %4, %20 : vector<8x128xi32>
    %22 = arith.extui %19 : vector<8x128xi1> to vector<8x128xi32>
    %23 = arith.sitofp %22 : vector<8x128xi32> to vector<8x128xf32>
    %24 = arith.extui %21 : vector<8x128xi1> to vector<8x128xi32>
    %25 = arith.sitofp %24 : vector<8x128xi32> to vector<8x128xf32>
    %26 = arith.select %19, %15, %17 : vector<8x128xi1>, vector<8x128xf32>
    %27 = arith.select %19, %17, %15 : vector<8x128xi1>, vector<8x128xf32>
    %cst_10 = arith.constant 2.500000e-01 : f32
    %cst_11 = arith.constant 7.500000e-01 : f32
    %28 = vector.broadcast %cst_10 : f32 to vector<8x128xf32>
    %29 = vector.broadcast %cst_11 : f32 to vector<8x128xf32>
    %30 = arith.select %19, %28, %29 : vector<8x128xi1>, vector<8x128xf32>
    %31 = arith.mulf %27, %27 : vector<8x128xf32>
    %cst_12 = arith.constant 0.000000e+00 : f32
    %32 = vector.broadcast %cst_12 : f32 to vector<8x128xf32>
    %33 = arith.subf %32, %30 : vector<8x128xf32>
    %34 = arith.mulf %33, %31 : vector<8x128xf32>
    %35 = math.log %26 : vector<8x128xf32>
    %36 = arith.mulf %34, %35 : vector<8x128xf32>
    %37 = arith.mulf %36, %23 : vector<8x128xf32>
    %38 = arith.mulf %36, %25 : vector<8x128xf32>
    %c0_13 = arith.constant 0 : index
    %c0_14 = arith.constant 0 : index
    %c0_15 = arith.constant 0 : index
    %39 = vector.load %arg4[%c0_13, %c0_14, %c0_15] : memref<1x8x128xf32, #tpu.memory_space<vmem>>, vector<1x8x128xf32>
    %40 = vector.shape_cast %37 : vector<8x128xf32> to vector<1x8x128xf32>
    %cst_16 = arith.constant dense<0.000000e+00> : vector<8x128xf32>
    %41 = vector.multi_reduction <add>, %40, %cst_16 [0] : vector<1x8x128xf32> to vector<8x128xf32>
    %42 = vector.shape_cast %41 : vector<8x128xf32> to vector<1x8x128xf32>
    %43 = arith.addf %39, %42 : vector<1x8x128xf32>
    %c0_17 = arith.constant 0 : index
    %c0_18 = arith.constant 0 : index
    %c0_19 = arith.constant 0 : index
    %44 = vector.load %arg4[%c0_17, %c0_18, %c0_19] : memref<1x8x128xf32, #tpu.memory_space<vmem>>, vector<1x8x128xf32>
    tpu.vector_store %arg4[%c0_17, %c0_18, %c0_19], %43 {strides = array<i32>} : memref<1x8x128xf32, #tpu.memory_space<vmem>>, vector<1x8x128xf32>,
    %c0_20 = arith.constant 0 : index
    %c0_21 = arith.constant 0 : index
    %c0_22 = arith.constant 0 : index
    %45 = vector.load %arg5[%c0_20, %c0_21, %c0_22] : memref<1x8x128xf32, #tpu.memory_space<vmem>>, vector<1x8x128xf32>
    %46 = vector.shape_cast %38 : vector<8x128xf32> to vector<1x8x128xf32>
    %cst_23 = arith.constant dense<0.000000e+00> : vector<8x128xf32>
    %47 = vector.multi_reduction <add>, %46, %cst_23 [0] : vector<1x8x128xf32> to vector<8x128xf32>
    %48 = vector.shape_cast %47 : vector<8x128xf32> to vector<1x8x128xf32>
    %49 = arith.addf %45, %48 : vector<1x8x128xf32>
    %c0_24 = arith.constant 0 : index
    %c0_25 = arith.constant 0 : index
    %c0_26 = arith.constant 0 : index
    %50 = vector.load %arg5[%c0_24, %c0_25, %c0_26] : memref<1x8x128xf32, #tpu.memory_space<vmem>>, vector<1x8x128xf32>
    tpu.vector_store %arg5[%c0_24, %c0_25, %c0_26], %49 {strides = array<i32>} : memref<1x8x128xf32, #tpu.memory_space<vmem>>, vector<1x8x128xf32>,
    %c0_27 = arith.constant 0 : index
    %c0_28 = arith.constant 0 : index
    %c0_29 = arith.constant 0 : index
    %51 = vector.load %arg6[%c0_27, %c0_28, %c0_29] : memref<1x8x128xf32, #tpu.memory_space<vmem>>, vector<1x8x128xf32>
    %52 = vector.shape_cast %23 : vector<8x128xf32> to vector<1x8x128xf32>
    %cst_30 = arith.constant dense<0.000000e+00> : vector<8x128xf32>
    %53 = vector.multi_reduction <add>, %52, %cst_30 [0] : vector<1x8x128xf32> to vector<8x128xf32>
    %54 = vector.shape_cast %53 : vector<8x128xf32> to vector<1x8x128xf32>
    %55 = arith.addf %51, %54 : vector<1x8x128xf32>
    %c0_31 = arith.constant 0 : index
    %c0_32 = arith.constant 0 : index
    %c0_33 = arith.constant 0 : index
    %56 = vector.load %arg6[%c0_31, %c0_32, %c0_33] : memref<1x8x128xf32, #tpu.memory_space<vmem>>, vector<1x8x128xf32>
    tpu.vector_store %arg6[%c0_31, %c0_32, %c0_33], %55 {strides = array<i32>} : memref<1x8x128xf32, #tpu.memory_space<vmem>>, vector<1x8x128xf32>,
    %c0_34 = arith.constant 0 : index
    %c0_35 = arith.constant 0 : index
    %c0_36 = arith.constant 0 : index
    %57 = vector.load %arg7[%c0_34, %c0_35, %c0_36] : memref<1x8x128xf32, #tpu.memory_space<vmem>>, vector<1x8x128xf32>
    %58 = vector.shape_cast %25 : vector<8x128xf32> to vector<1x8x128xf32>
    %cst_37 = arith.constant dense<0.000000e+00> : vector<8x128xf32>
    %59 = vector.multi_reduction <add>, %58, %cst_37 [0] : vector<1x8x128xf32> to vector<8x128xf32>
    %60 = vector.shape_cast %59 : vector<8x128xf32> to vector<1x8x128xf32>
    %61 = arith.addf %57, %60 : vector<1x8x128xf32>
    %c0_38 = arith.constant 0 : index
    %c0_39 = arith.constant 0 : index
    %c0_40 = arith.constant 0 : index
    %62 = vector.load %arg7[%c0_38, %c0_39, %c0_40] : memref<1x8x128xf32, #tpu.memory_space<vmem>>, vector<1x8x128xf32>
    tpu.vector_store %arg7[%c0_38, %c0_39, %c0_40], %61 {strides = array<i32>} : memref<1x8x128xf32, #tpu.memory_space<vmem>>, vector<1x8x128xf32>,
    return
  }
  func.func @transform_0(%arg0: i32, %arg1: i32) -> (i32, i32) {
    %c1_i32 = arith.constant 1 : i32
    %0 = arith.muli %arg0, %c1_i32 : i32
    %1 = arith.addi %0, %arg1 : i32
    %c0_i32 = arith.constant 0 : i32
    %c0_i32_0 = arith.constant 0 : i32
    return %1, %c0_i32 : i32, i32
  }
  func.func @transform_1(%arg0: i32, %arg1: i32) -> (i32, i32) {
    %c1_i32 = arith.constant 1 : i32
    %0 = arith.muli %arg0, %c1_i32 : i32
    %1 = arith.addi %0, %arg1 : i32
    %c0_i32 = arith.constant 0 : i32
    %c0_i32_0 = arith.constant 0 : i32
    return %1, %c0_i32 : i32, i32
  }
  func.func @transform_2(%arg0: i32, %arg1: i32) -> (i32, i32, i32) {
    %c0_i32 = arith.constant 0 : i32
    %c0_i32_0 = arith.constant 0 : i32
    %c0_i32_1 = arith.constant 0 : i32
    return %arg0, %c0_i32, %c0_i32_0 : i32, i32, i32
  }
  func.func @transform_3(%arg0: i32, %arg1: i32) -> (i32, i32, i32) {
    %c0_i32 = arith.constant 0 : i32
    %c0_i32_0 = arith.constant 0 : i32
    %c0_i32_1 = arith.constant 0 : i32
    return %arg0, %c0_i32, %c0_i32_0 : i32, i32, i32
  }
  func.func @transform_4(%arg0: i32, %arg1: i32) -> (i32, i32, i32) {
    %c0_i32 = arith.constant 0 : i32
    %c0_i32_0 = arith.constant 0 : i32
    %c0_i32_1 = arith.constant 0 : i32
    return %arg0, %c0_i32, %c0_i32_0 : i32, i32, i32
  }
  func.func @transform_5(%arg0: i32, %arg1: i32) -> (i32, i32, i32) {
    %c0_i32 = arith.constant 0 : i32
    %c0_i32_0 = arith.constant 0 : i32
    %c0_i32_1 = arith.constant 0 : i32
    return %arg0, %c0_i32, %c0_i32_0 : i32, i32, i32
  }
}

</mosaic_0001>

<bundles_post_ra>
// kernel: tpu_custom_call.1
= control target key start
LH: loop header
LB: loop body
LE: loop exit
PB: predicated region body
PF: predicated region fallthrough
CT: control target
= control target key end

     0   :  { %s1376_s0 = inlined_call_operand.hbm [shape: f32[16,128], index: 0, kind: input, shape index: {}]   ;;  %s1377_s1 = inlined_call_operand.hbm [shape: s32[16,128], index: 1, kind: input, shape index: {}]   ;;  %s1378_s2 = inlined_call_operand.hbm [shape: f32[2,8,128], index: 2, kind: output, shape index: {0}]   ;;  %s1379_s3 = inlined_call_operand.hbm [shape: f32[2,8,128], index: 3, kind: output, shape index: {1}]   ;;  %s1380_s4 = inlined_call_operand.hbm [shape: f32[2,8,128], index: 4, kind: output, shape index: {2}]   ;;  %s1381_s5 = inlined_call_operand.hbm [shape: f32[2,8,128], index: 5, kind: output, shape index: {3}]  }
   0x1   :  { %1386 = sst [smem:[#allocation18_spill]] %s1376_s0 }
   0x2   :  { %1387 = sst [smem:[#allocation19_spill]] %s1377_s1 }
   0x3   :  { %11 = vsyncpa [#allocation3], 0 }
   0x4   :  { %13 = vsyncpa [#allocation3 + $0x1], 0 }
   0x5   :  { %14 = vsyncpa [#allocation6], 0 }
   0x6   :  { %16 = vsyncpa [#allocation6 + $0x1], 0 }
   0x7   :  { %17 = vsyncpa [#allocation4], 0 }
   0x8   :  { %19 = vsyncpa [#allocation4 + $0x1], 0 }
   0x9   :  { %20 = vsyncpa [#allocation9], 0 }
   0xa   :  { %22 = vsyncpa [#allocation9 + $0x1], 0 }
   0xb   :  { %23 = vsyncpa [#allocation12], 0 }
   0xc   :  { %25 = vsyncpa [#allocation12 + $0x1], 0  ;;  %s1036_s18 = smov 0   ;;  %s1038_s19 = smov 0  }
   0xd   :  { %s1040_s20 = smov 0   ;;  %s1042_s21 = smov 0  }
   0xe   :  { %s1044_s22 = smov 0   ;;  %s1046_s23 = smov 0  }
   0xf LB: > { %s1067_s24 = sadd.s32 4294967295, %s996_s23   ;;  %s1382_s25 = sadd.s32 4294967294, %s996_s23   ;;  %s996_s23 = sphi %s1046_s23, %s31_s23   ;;  %s992_s22 = sphi %s1044_s22, %s1409_s22   ;;  %s988_s21 = sphi %s1042_s21, %s1408_s21   ;;  %s984_s20 = sphi %s1040_s20, %s1407_s20   ;;  %s980_s19 = sphi %s1038_s19, %s1406_s19   ;;  %s976_s18 = sphi %s1036_s18, %s1405_s18  }
  0x10   : > { %s43_s26 = sadd.s32 1, %s992_s22  ;;  %s52_s27 = sadd.s32 1, %s984_s20 }
  0x11   : > { %p45_p0 = scmp.ge.s32.totalorder %s43_s26, 2  ;;  %p59_p1 = scmp.ne.s32.totalorder %s984_s20, %s980_s19 }
  0x12   : > { %p60_p2 = scmp.eq.s32.totalorder %s996_s23, 0  ;;  %p65_p3 = scmp.ne.s32.totalorder %s980_s19, %s976_s18 }
  0x13   : > { %s1411_s26 = smov (%p45_p0, %s43_s26), 0  ;;  %p66_p5 = scmp.eq.s32.totalorder %s1067_s24, 0 }
  0x14   : > { %p1079_p4 = por %p60_p2, %p59_p1  ;;  %s49_s29 = ssub.s32 %s992_s22, %s1411_s26 }
  0x15   : > { %p117_p6 = scmp.eq.s32.totalorder %s1067_s24, 1  ;;  %p50_p7 = scmp.eq.s32.totalorder %s49_s29, 0 }
  0x16   : > { %p1087_p8 = por %p66_p5, %p65_p3  ;;  %p123_p10 = scmp.eq.s32.totalorder %s1382_s25, 1 }
  0x17   : > { %p1091_p9 = por %p117_p6, %p59_p1  ;;  %p700_p13 = scmp.lt.s32.totalorder %s996_s23, 2 }
  0x18   : > { %s1389_s30 = scalar_select %p1087_p8, 1, 0 }
  0x19   : > { %s1390_s6 = scalar_select %p1091_p9, 1, 0 }
  0x1a   : > { %s1098_s7 = scalar_select %p50_p7, %s984_s20, %s52_s27  }
  0x1b   : > { %p1100_p11 = por %p123_p10, %p65_p3  ;;  %s1107_s9 = sand.u32 1, %s984_s20  }
  0x1c   : > { %s1383_s10 = sshll.u32 %s1107_s9, 3  ;;  %s646_s11 = sshll.u32 %s992_s22, 7 }
  0x1d   : > { %s1391_s8 = scalar_select %p1100_p11, 1, 0 }
  0x1e   : > { %s1392_s0 = sld [smem:[#allocation18_spill]]  ;;  %s225_s15 = scalar_lea.vmem [#allocation2], %s1383_s10 }
  0x1f   : > { %s233_s16 = sshll.u32 %s225_s15, 4  ;;  %p1124_p0 = pnand %p700_p13, %p1079_p4  ;;  %s1120_s16 = int_to_ptr.vmem [resolvable:$true] %s233_s16 }
  0x20   : > { %s222_s27 = scalar_lea.sflag [#allocation3], %s1107_s9 }
  0x21   : > { %p760_p5 = pneg %p1124_p0 }
  0x24   : > { %s1116_s14 = scalar_lea.hbm %s1392_s0, %s646_s11  ;;  %s763_s28 = scalar_lea.hbm %s1392_s0, 256 }
  0x25   : > { %s758_s29 = scalar_lea.hbm %s1116_s14, 128  ;;  %p764_p4 = scmp.lt.u32.totalorder %s1116_s14, %s1392_s0 }
  0x26   : > { %p759_p3 = scmp.ne.s32.totalorder %s1116_s14, %s758_s29  ;;  %p765_p10 = scmp.lt.u32.totalorder %s763_s28, %s758_s29 }
  0x27   : > { %p767_p12 = scmp.lt.u32.totalorder %s758_s29, %s1116_s14 }
  0x28   : > { %p761_p6 = pnand %p760_p5, %p759_p3  ;;  %p766_p13 = por %p765_p10, %p764_p4 }
  0x2a   : > { %p762_p7 = pneg %p761_p6  ;;  %p768_p1 = por %p767_p12, %p766_p13 }
  0x2c   : > { %p769_p2 = pnand %p768_p1, %p762_p7 }
  0x2e   : > { %772 = shalt.err (!%p769_p2)
}
  0x2f   : > { %s773_s10 = scalar_lea.vmem %s1120_s16, 128  ;;  %s998_s12 = smov [#allocation2]  }
  0x30   : > { %p774_p3 = scmp.ne.s32.totalorder %s1120_s16, %s773_s10  ;;  %s778_s13 = sshll.u32 %s998_s12, 4  ;;  %s779_s13 = int_to_ptr.vmem [resolvable:$false] %s778_s13 }
  0x31   : > { %s780_s25 = scalar_lea.vmem %s779_s13, 256  ;;  %p781_p9 = scmp.lt.s32.totalorder %s1120_s16, %s779_s13 }
  0x32   : > { %p776_p6 = pnand %p774_p3, %p760_p5  ;;  %p782_p4 = scmp.lt.s32.totalorder %s780_s25, %s773_s10 }
  0x34   : > { %p777_p11 = pneg %p776_p6  ;;  %p783_p10 = por %p782_p4, %p781_p9 }
  0x36   : > { %p784_p12 = pnand %p783_p10, %p777_p11 }
  0x38   : > { %787 = shalt.err (!%p784_p12)
}
  0x39   : > { %683 = dma.hbm_to_vmem [thread:$0]  (!%p1124_p0), %s1116_s14, 128, %s1120_s16, %s222_s27  }
  0x3a   : > { %p1394_p1 = scmp.lt.s32.totalorder %s996_s23, 3  ;;  %p1395_p2 = scmp.ge.s32.totalorder %s996_s23, 1 }
  0x3b   : > { %s1397_s1 = sld [smem:[#allocation19_spill]]  ;;  %s1398_s12 = sshll.u32 %s1107_s9, 3 }
  0x3c   : > { %p1160_p7 = pnand %p1395_p2, %p1394_p1  ;;  %s244_s13 = scalar_lea.vmem [#allocation5], %s1398_s12 }
  0x3d   : > { %s252_s25 = sshll.u32 %s244_s13, 4  ;;  %s241_s14 = scalar_lea.sflag [#allocation6], %s1107_s9  ;;  %s253_s25 = int_to_ptr.vmem [resolvable:$true] %s252_s25 }
  0x3e   : > { %s1396_s29 = scalar_select %p1160_p7, 1, 0 }
  0x41   : > { %s1169_s15 = scalar_lea.hbm %s1397_s1, %s646_s11  ;;  %s793_s11 = scalar_lea.hbm %s1397_s1, 256 }
  0x42   : > { %s788_s16 = scalar_lea.hbm %s1169_s15, 128  ;;  %p794_p3 = scmp.lt.u32.totalorder %s1169_s15, %s1397_s1 }
  0x43   : > { %p789_p9 = scmp.ne.s32.totalorder %s1169_s15, %s788_s16  ;;  %p795_p6 = scmp.lt.u32.totalorder %s793_s11, %s788_s16 }
  0x44   : > { %p797_p10 = scmp.lt.u32.totalorder %s788_s16, %s1169_s15 }
  0x45   : > { %p791_p11 = pnand %p789_p9, %p760_p5  ;;  %p796_p4 = por %p795_p6, %p794_p3 }
  0x47   : > { %p792_p13 = pneg %p791_p11  ;;  %p798_p12 = por %p797_p10, %p796_p4 }
  0x49   : > { %p799_p1 = pnand %p798_p12, %p792_p13 }
  0x4b   : > { %802 = shalt.err (!%p799_p1)
}
  0x4c   : > { %s803_s9 = scalar_lea.vmem %s253_s25, 128  ;;  %s999_s12 = smov [#allocation5]  }
  0x4d   : > { %p804_p2 = scmp.ne.s32.totalorder %s253_s25, %s803_s9  ;;  %s808_s0 = sshll.u32 %s999_s12, 4  ;;  %s809_s0 = int_to_ptr.vmem [resolvable:$false] %s808_s0 }
  0x4e   : > { %s810_s13 = scalar_lea.vmem %s809_s0, 256  ;;  %p811_p8 = scmp.lt.s32.totalorder %s253_s25, %s809_s0 }
  0x4f   : > { %p806_p9 = pnand %p804_p2, %p760_p5  ;;  %p812_p7 = scmp.lt.s32.totalorder %s810_s13, %s803_s9 }
  0x51   : > { %p807_p11 = pneg %p806_p9  ;;  %p813_p3 = por %p812_p7, %p811_p8 }
  0x53   : > { %p814_p6 = pnand %p813_p3, %p807_p11 }
  0x55   : > { %817 = shalt.err (!%p814_p6)
}
  0x56   : > { %686 = dma.hbm_to_vmem [thread:$0]  (!%p1124_p0), %s1169_s15, 128, %s253_s25, %s241_s14  }
  0x57   : > { %p1399_p13 = scmp.ne.s32.totalorder %s1396_s29, 0 }
  0x58   : > { %s1196_s16 = sand.u32 (!%p1399_p13), 1, %s980_s19   ;;  %p1400_p8 = scmp.ne.s32.totalorder (!%p1399_p13), %s1389_s30, 0 }
  0x59   : > { %261 = sbr.rel (%p1399_p13) target bundleno = 221 (0xdd), region = 28  ;;  %s1199_s27 = sshll.u32 (!%p1399_p13), %s1196_s16, 3 }
  0x5a   : > { %s264_s11 = scalar_lea.sflag (!%p1399_p13), [#allocation3], %s1196_s16  ;;  %s267_s10 = scalar_lea.vmem (!%p1399_p13), [#allocation2], %s1199_s27 }
  0x60   : > { %955 = dma.done.wait (%p1400_p8), %s264_s11, 128  }
  0x61   : > { %957 = vsyncadd (%p1400_p8), %s264_s11, 4294967168  ;;  %s273_s17 = scalar_lea.sflag [#allocation6], %s1196_s16  ;;  %s276_s29 = scalar_lea.vmem [#allocation5], %s1199_s27 }
  0x62   : > { %959 = dma.done.wait (%p1400_p8), %s273_s17, 128  }
  0x63   : > { %961 = vsyncadd (%p1400_p8), %s273_s17, 4294967168  ;;  %v333_v0 = vld [vmem:[%s267_s10] sm:$0xff]  ;;  %v334_v1 = vld [vmem:[%s276_s29] sm:$0xff]  ;;  %s1214_s15 = sshll.u32 %s988_s21, 7  ;;  %v1000_v3 = vmov 0.0   ;;  %s322_s30 = scalar_lea.vmem [#allocation11], %s1199_s27 }
  0x64   : > { %v335_v2 = vsub.f32 0.0, %v333_v0  ;;  %vm344_vm0 = vcmp.eq.s32.totalorder %v334_v1, 1  ;;  %vm345_vm1 = vcmp.eq.s32.totalorder %v334_v1, 0  ;;  %s445_s25 = sshll.u32 %s322_s30, 4  ;;  %s1222_s9 = scalar_lea.hbm %s1381_s5, %s1214_s15  ;;  %s1224_s25 = int_to_ptr.vmem [resolvable:$true] %s445_s25 }
  0x65   : > { %v657_v4 = vsel %vm345_vm1, 1.0, %v1000_v3  ;;  %v656_v5 = vsel %vm344_vm0, 1.0, %v1000_v3  ;;  %s315_s21 = scalar_lea.vmem [#allocation10], %s1199_s27  ;;  %s393_s12 = scalar_lea.sflag [#allocation12], %s1196_s16 }
  0x66   : > { %v336_v6 = vmul.f32 1.442695, %v335_v2  ;;  %372 = vst [vmem:[%s315_s21] sm:$0xff] %v656_v5  ;;  %376 = vst [vmem:[%s322_s30] sm:$0xff] %v657_v4  ;;  %s818_s0 = scalar_lea.vmem %s1224_s25, 128  ;;  %p1401_p5 = scmp.ne.s32.totalorder %s1390_s6, 0 }
  0x67   : > { %p819_p0 = scmp.ne.s32.totalorder %s1224_s25, %s818_s0  ;;  %s1001_s13 = smov [#allocation11]  }
  0x68   : > { %752 = vpow2.f32 %v336_v6  ;;  %s822_s11 = sshll.u32 %s1001_s13, 4  ;;  %s823_s11 = int_to_ptr.vmem [resolvable:$false] %s822_s11 }
  0x69   : > { %p820_p7 = pnand %p819_p0, %p1401_p5  ;;  %s824_s10 = scalar_lea.vmem %s823_s11, 256 }
  0x6a   : > { %p825_p10 = scmp.lt.s32.totalorder %s1224_s25, %s823_s11  ;;  %p826_p12 = scmp.lt.s32.totalorder %s824_s10, %s818_s0 }
  0x6b   : > { %p821_p4 = pneg %p820_p7 }
  0x6c   : > { %p827_p1 = por %p826_p12, %p825_p10 }
  0x6e   : > { %p828_p2 = pnand %p827_p1, %p821_p4 }
  0x70   : > { %831 = shalt.err (!%p828_p2)
}
  0x71   : > { %s832_s17 = scalar_lea.hbm %s1222_s9, 128  ;;  %s836_s14 = scalar_lea.hbm %s1381_s5, 256 }
  0x72   : > { %p833_p9 = scmp.ne.s32.totalorder %s1222_s9, %s832_s17  ;;  %p837_p6 = scmp.lt.u32.totalorder %s1222_s9, %s1381_s5 }
  0x73   : > { %p838_p13 = scmp.lt.u32.totalorder %s836_s14, %s832_s17  ;;  %p840_p0 = scmp.lt.u32.totalorder %s832_s17, %s1222_s9 }
  0x74   : > { %p834_p11 = pnand %p833_p9, %p1401_p5 }
  0x75   : > { %p839_p8 = por %p838_p13, %p837_p6 }
  0x76   : > { %p835_p3 = pneg %p834_p11 }
  0x77   : > { %p841_p7 = por %p840_p0, %p839_p8 }
  0x79   : > { %p842_p4 = pnand %p841_p7, %p835_p3 }
  0x7b   : > { %845 = shalt.err (!%p842_p4)
}
  0x7c   : > { %675 = dma.vmem_to_hbm [thread:$0]  (%p1401_p5), %s1224_s25, 128, %s1222_s9, %s393_s12   ;;  %v753_v7 = vpop.eup %752  ;;  %v1002_v15 = vmov 0.75  }
  0x7d   : > { %v338_v8 = vadd.f32 1.0, %v753_v7  ;;  %v352_v16 = vsel %vm344_vm0, 0.25, %v1002_v15  ;;  %s382_s25 = sand.u32 1, %s1067_s24   ;;  %s308_s9 = scalar_lea.vmem [#allocation8], %s1199_s27 }
  0x7e   : > { %v354_v18 = vsub.f32 0.0, %v352_v16  ;;  %s419_s12 = sshll.u32 %s308_s9, 4  ;;  %s432_s0 = sshll.u32 %s315_s21, 4  ;;  %s1265_s12 = int_to_ptr.vmem [resolvable:$true] %s419_s12  ;;  %s1275_s0 = int_to_ptr.vmem [resolvable:$true] %s432_s0 }
  0x7f   : > { %754 = vrcp.f32 %v338_v8  ;;  %s301_s11 = scalar_lea.vmem [#allocation7], %s1199_s27  ;;  %s1263_s30 = scalar_lea.hbm %s1379_s3, %s1214_s15 }
  0x80   : > { %s406_s10 = sshll.u32 %s301_s11, 4  ;;  %s1271_s24 = scalar_lea.hbm %s1378_s2, %s1214_s15  ;;  %s1273_s10 = int_to_ptr.vmem [resolvable:$true] %s406_s10 }
  0x81   : > { %s1281_s13 = scalar_lea.hbm %s1380_s4, %s1214_s15  ;;  %s1283_s17 = scalar_lea.sflag [#allocation9], %s382_s25 }
  0x82   : > { %s846_s29 = scalar_lea.vmem %s1265_s12, 128  ;;  %s1003_s14 = smov [#allocation8]  }
  0x83   : > { %p847_p10 = scmp.ne.s32.totalorder %s1265_s12, %s846_s29  ;;  %s850_s28 = sshll.u32 %s1003_s14, 4  ;;  %s851_s28 = int_to_ptr.vmem [resolvable:$false] %s850_s28 }
  0x84   : > { %s852_s1 = scalar_lea.vmem %s851_s28, 256  ;;  %p853_p2 = scmp.lt.s32.totalorder %s1265_s12, %s851_s28 }
  0x85   : > { %p848_p12 = pnand %p847_p10, %p1401_p5  ;;  %p854_p9 = scmp.lt.s32.totalorder %s852_s1, %s846_s29 }
  0x87   : > { %p849_p1 = pneg %p848_p12  ;;  %p855_p11 = por %p854_p9, %p853_p2 }
  0x89   : > { %v755_v9 = vpop.eup %754  ;;  %p856_p3 = pnand %p855_p11, %p849_p1 }
  0x8a   : > { %v341_v10 = vmax.f32 %v755_v9, 1e-06 }
  0x8c   : > { %v342_v11 = vmin.f32 %v341_v10, 0.999999 }
  0x8e   : > { %v343_v12 = vsub.f32 1.0, %v342_v11 }
  0x90   : > { %v350_v13 = vsel %vm344_vm0, %v342_v11, %v343_v12  ;;  %v351_v14 = vsel %vm344_vm0, %v343_v12, %v342_v11 }
  0x91   : > { %756 = vlog2.f32 %v350_v13  ;;  %v353_v17 = vmul.f32 %v351_v14, %v351_v14 }
  0x93   : > { %v355_v19 = vmul.f32 %v354_v18, %v353_v17 }
  0x9b   : > { %v757_v20 = vpop.eup %756 }
  0x9c   : > { %v357_v21 = vmul.f32 0.6931472, %v757_v20 }
  0x9e   : > { %v358_v22 = vmul.f32 %v357_v21, %v355_v19 }
  0xa0   : > { %v360_v23 = vmul.f32 %v657_v4, %v358_v22  ;;  %v359_v24 = vmul.f32 %v656_v5, %v358_v22 }
  0xa2   : > { %368 = vst [vmem:[%s308_s9] sm:$0xff] %v360_v23  ;;  %364 = vst [vmem:[%s301_s11] sm:$0xff] %v359_v24 }
  0xa3   : > { %859 = shalt.err (!%p856_p3)
}
  0xa4   : > { %s860_s15 = scalar_lea.hbm %s1263_s30, 128  ;;  %s864_s11 = scalar_lea.hbm %s1379_s3, 256 }
  0xa5   : > { %p861_p6 = scmp.ne.s32.totalorder %s1263_s30, %s860_s15  ;;  %p865_p0 = scmp.lt.u32.totalorder %s1263_s30, %s1379_s3 }
  0xa6   : > { %p866_p7 = scmp.lt.u32.totalorder %s864_s11, %s860_s15  ;;  %p868_p10 = scmp.lt.u32.totalorder %s860_s15, %s1263_s30 }
  0xa7   : > { %p862_p13 = pnand %p861_p6, %p1401_p5 }
  0xa8   : > { %p867_p4 = por %p866_p7, %p865_p0 }
  0xa9   : > { %p863_p8 = pneg %p862_p13 }
  0xaa   : > { %p869_p12 = por %p868_p10, %p867_p4 }
  0xac   : > { %p870_p1 = pnand %p869_p12, %p863_p8 }
  0xae   : > { %873 = shalt.err (!%p870_p1)
}
  0xaf   : > { %673 = dma.vmem_to_hbm [thread:$0]  (%p1401_p5), %s1265_s12, 128, %s1263_s30, %s1283_s17  }
  0xb0   : > { %s378_s1 = scalar_lea.sflag [#allocation4], %s1196_s16  ;;  %s874_s29 = scalar_lea.vmem %s1273_s10, 128 }
  0xb1   : > { %p875_p2 = scmp.ne.s32.totalorder %s1273_s10, %s874_s29  ;;  %s1004_s14 = smov [#allocation7]  }
  0xb2   : > { %s878_s28 = sshll.u32 %s1004_s14, 4  ;;  %s879_s28 = int_to_ptr.vmem [resolvable:$false] %s878_s28 }
  0xb3   : > { %p876_p9 = pnand %p875_p2, %p1401_p5  ;;  %s880_s15 = scalar_lea.vmem %s879_s28, 256 }
  0xb4   : > { %p881_p3 = scmp.lt.s32.totalorder %s1273_s10, %s879_s28  ;;  %p882_p6 = scmp.lt.s32.totalorder %s880_s15, %s874_s29 }
  0xb5   : > { %p877_p11 = pneg %p876_p9 }
  0xb6   : > { %p883_p13 = por %p882_p6, %p881_p3 }
  0xb8   : > { %p884_p8 = pnand %p883_p13, %p877_p11 }
  0xba   : > { %887 = shalt.err (!%p884_p8)
}
  0xbb   : > { %s888_s16 = scalar_lea.hbm %s1271_s24, 128  ;;  %s892_s25 = scalar_lea.hbm %s1378_s2, 256 }
  0xbc   : > { %p889_p0 = scmp.ne.s32.totalorder %s1271_s24, %s888_s16  ;;  %p893_p10 = scmp.lt.u32.totalorder %s1271_s24, %s1378_s2 }
  0xbd   : > { %p894_p12 = scmp.lt.u32.totalorder %s892_s25, %s888_s16  ;;  %p896_p2 = scmp.lt.u32.totalorder %s888_s16, %s1271_s24 }
  0xbe   : > { %p890_p7 = pnand %p889_p0, %p1401_p5 }
  0xbf   : > { %p895_p1 = por %p894_p12, %p893_p10 }
  0xc0   : > { %p891_p4 = pneg %p890_p7 }
  0xc1   : > { %p897_p9 = por %p896_p2, %p895_p1 }
  0xc3   : > { %p898_p11 = pnand %p897_p9, %p891_p4 }
  0xc5   : > { %901 = shalt.err (!%p898_p11)
}
  0xc6   : > { %672 = dma.vmem_to_hbm [thread:$0]  (%p1401_p5), %s1273_s10, 128, %s1271_s24, %s378_s1  }
  0xc7   : > { %s902_s27 = scalar_lea.vmem %s1275_s0, 128  ;;  %s1005_s21 = smov [#allocation10]  }
  0xc8   : > { %p903_p3 = scmp.ne.s32.totalorder %s1275_s0, %s902_s27  ;;  %s906_s29 = sshll.u32 %s1005_s21, 4  ;;  %s907_s29 = int_to_ptr.vmem [resolvable:$false] %s906_s29 }
  0xc9   : > { %s908_s14 = scalar_lea.vmem %s907_s29, 256  ;;  %p909_p8 = scmp.lt.s32.totalorder %s1275_s0, %s907_s29 }
  0xca   : > { %p904_p6 = pnand %p903_p3, %p1401_p5  ;;  %p910_p0 = scmp.lt.s32.totalorder %s908_s14, %s902_s27 }
  0xcc   : > { %p905_p13 = pneg %p904_p6  ;;  %p911_p7 = por %p910_p0, %p909_p8 }
  0xce   : > { %p912_p4 = pnand %p911_p7, %p905_p13 }
  0xd0   : > { %915 = shalt.err (!%p912_p4)
}
  0xd1   : > { %s916_s10 = scalar_lea.hbm %s1281_s13, 128  ;;  %s920_s28 = scalar_lea.hbm %s1380_s4, 256 }
  0xd2   : > { %p917_p10 = scmp.ne.s32.totalorder %s1281_s13, %s916_s10  ;;  %p921_p2 = scmp.lt.u32.totalorder %s1281_s13, %s1380_s4 }
  0xd3   : > { %p922_p9 = scmp.lt.u32.totalorder %s920_s28, %s916_s10  ;;  %p924_p3 = scmp.lt.u32.totalorder %s916_s10, %s1281_s13 }
  0xd4   : > { %p918_p12 = pnand %p917_p10, %p1401_p5 }
  0xd5   : > { %p923_p11 = por %p922_p9, %p921_p2 }
  0xd6   : > { %p919_p1 = pneg %p918_p12 }
  0xd7   : > { %p925_p6 = por %p924_p3, %p923_p11 }
  0xd9   : > { %p926_p13 = pnand %p925_p6, %p919_p1 }
  0xdb   : > { %929 = shalt.err (!%p926_p13)
}
  0xdc   : > { %674 = dma.vmem_to_hbm [thread:$0]  (%p1401_p5), %s1275_s0, 128, %s1281_s13, %s1283_s17  }
  0xdd PF: > { %s457_s12 = sand.u32 1, %s976_s18   ;;  %p1402_p8 = scmp.ne.s32.totalorder %s1391_s8, 0 }
  0xde   : > { %p1403_p0 = scmp.ge.s32.totalorder %s996_s23, 2  ;;  %s458_s30 = scalar_lea.sflag [#allocation4], %s457_s12 }
  0xe0   : > { %p688_p7 = pnand %p1403_p0, %p1402_p8 }
  0xe2   : > { %963 = dma.done.wait (!%p688_p7), %s458_s30, 128  }
  0xe3   : > { %965 = vsyncadd (!%p688_p7), %s458_s30, 4294967168  ;;  %s1404_s25 = sadd.s32 4294967294, %s996_s23  }
  0xe4   : > { %s466_s9 = sand.u32 1, %s1404_s25  }
  0xe5   : > { %s467_s11 = scalar_lea.sflag [#allocation9], %s466_s9 }
  0xe6   : > { %967 = dma.done.wait (!%p688_p7), %s467_s11, 256  }
  0xe7   : > { %969 = vsyncadd (!%p688_p7), %s467_s11, 4294967040  ;;  %s485_s6 = scalar_lea.sflag [#allocation12], %s457_s12 }
  0xe8   : > { %971 = dma.done.wait (!%p688_p7), %s485_s6, 128  }
  0xe9   : > { %973 = vsyncadd (!%p688_p7), %s485_s6, 4294967168  ;;  %s31_s23 = sadd.s32 1, %s996_s23   ;;  %s1405_s18 = smov %s980_s19 }
  0xea   : > { %p28_p5 = scmp.ge.s32.totalorder %s31_s23, 4   ;;  %s1406_s19 = smov %s984_s20 }
  0xeb   : > { %s1407_s20 = smov %s1098_s7  ;;  %s1408_s21 = smov %s992_s22 }
  0xec   : > { %s1409_s22 = smov %s1411_s26  ;;  %30 = sbr.rel (!%p28_p5) target bundleno = 15 (0xf), region = 139 }
  0xf3   :  { %490 = vsyncpa [#allocation3], 1 }
  0xf4   :  { %492 = vsyncpa [#allocation3 + $0x1], 1 }
  0xf5   :  { %493 = vsyncpa [#allocation6], 1 }
  0xf6   :  { %495 = vsyncpa [#allocation6 + $0x1], 1 }
  0xf7   :  { %496 = vsyncpa [#allocation4], 1 }
  0xf8   :  { %498 = vsyncpa [#allocation4 + $0x1], 1 }
  0xf9   :  { %499 = vsyncpa [#allocation9], 1 }
  0xfa   :  { %501 = vsyncpa [#allocation9 + $0x1], 1 }
  0xfb   :  { %502 = vsyncpa [#allocation12], 1 }
  0xfc   :  { %504 = vsyncpa [#allocation12 + $0x1], 1 }

</bundles_post_ra>
